<compile_context>
chip_gen: v7x
topology: tpu7x:2x2x1
jax: 0.10.0
libtpu: 0.0.40
codegen_flags: <defaults>
</compile_context>

<pallas_src>
import jax
import jax.numpy as jnp
from jax import lax
from jax.experimental import pallas as pl
from jax.experimental.pallas import tpu as pltpu


def _round_up(x, m):
    return ((x + m - 1) // m) * m


def cml_kernel(uid_ref, pid_ref, nid_ref, user_tab_ref, item_tab_ref, o_ref):
    # uid/pid/nid_ref : (b_pad,) int32 in SMEM (scalar prefetch).
    # user_tab_ref    : (U, 3D) VMEM-resident, row u = [emb_u | 0 | 0].
    # item_tab_ref    : (I, 3D) VMEM-resident, row i = [0 | emb_i | emb_i].
    # o_ref           : (tb, 3D) output tile for this batch tile.
    tb, width = o_ref.shape
    d = width // 3
    base = pl.program_id(0) * tb

    # Constant lane masks selecting the pos / neg slots; hoisted out of the
    # row loop (JAX does not CSE broadcasts inside loops).
    lane = lax.broadcasted_iota(jnp.int32, (1, width), 1)
    pos_mask = (lane >= d) & (lane < 2 * d)
    neg_mask = lane >= 2 * d

    def body(j, carry):
        u = uid_ref[base + j]
        p = pid_ref[base + j]
        n = nid_ref[base + j]
        # Full-width (1, 3D) rows, already sitting on their destination lanes.
        u_row = user_tab_ref[pl.ds(u, 1), :]
        p_row = item_tab_ref[pl.ds(p, 1), :]
        n_row = item_tab_ref[pl.ds(n, 1), :]
        row = (u_row
               + jnp.where(pos_mask, p_row, 0.0)
               + jnp.where(neg_mask, n_row, 0.0))
        # Single lane-offset-0 store per row (was 3 masked stores in v2).
        o_ref[pl.ds(j, 1), :] = row
        return carry

    # tb is always a multiple of 8; unroll=8 exposes ILP across rows so the
    # scalar-load / address-math / store chain of one row overlaps the next.
    lax.fori_loop(0, tb, body, 0, unroll=8)


def cml_forward(data, user_emb, item_emb, *, tile_rows=512, core_parallel=False):
    """CML forward pass.

    data     : (B, 4) int — columns [user_id, pos_item, _, neg_item].
    user_emb : (U, D) float embedding table.
    item_emb : (I, D) float embedding table.
    Returns (B, D, 3), matching torch.cat([u, p, n], 1).reshape(-1, D, 3).
    """
    B = data.shape[0]
    U, D = user_emb.shape
    I = item_emb.shape[0]
    dt = user_emb.dtype

    # Batch tile: multiple of 8 sublanes, big enough to amortize per-step cost.
    tb = min(_round_up(tile_rows, 8), _round_up(B, 8))
    num_tiles = pl.cdiv(B, tb)
    b_pad = num_tiles * tb

    # Flat int32 index vectors for scalar prefetch (SMEM), clamped so a bad id
    # can never dynamic-slice out of the resident tables (no VMEM OOB checks).
    uid = jnp.clip(data[:, 0].astype(jnp.int32), 0, U - 1)
    pid = jnp.clip(data[:, 1].astype(jnp.int32), 0, I - 1)
    nid = jnp.clip(data[:, 3].astype(jnp.int32), 0, I - 1)
    if b_pad != B:
        pad = b_pad - B
        uid = jnp.pad(uid, (0, pad))   # padded rows gather row 0, sliced off below
        pid = jnp.pad(pid, (0, pad))
        nid = jnp.pad(nid, (0, pad))

    # Pre-place each table on its destination lane slot of the 3D-wide output
    # row, so the kernel needs one store per row and no cross-lane shuffles.
    # VMEM cost is unchanged: a D=20 row was already lane-padded to 128.
    user_pad = jnp.concatenate([user_emb, jnp.zeros((U, 2 * D), dt)], axis=1)      # (U, 3D)
    item_pad = jnp.concatenate([jnp.zeros((I, D), dt), item_emb, item_emb], axis=1)  # (I, 3D)

    # Resident tables: full-array blocks with a constant index_map -> one
    # HBM->VMEM DMA each, never re-fetched across batch tiles.
    user_spec = pl.BlockSpec((U, 3 * D), lambda i, u, p, n: (0, 0))
    item_spec = pl.BlockSpec((I, 3 * D), lambda i, u, p, n: (0, 0))
    out_spec = pl.BlockSpec((tb, 3 * D), lambda i, u, p, n: (i, 0))

    elem = jnp.dtype(dt).itemsize
    cost = pl.CostEstimate(
        flops=4 * b_pad * 3 * D,                       # 2 selects + 2 adds / elem
        transcendentals=0,
        bytes_accessed=int((U + I) * 3 * D * elem      # one-time table DMA
                           + b_pad * 3 * D * elem      # output writeback
                           + 3 * b_pad * 4),           # SMEM index prefetch
    )

    if core_parallel:
        # v7x: shard batch tiles across the chip's 2 TensorCores (each core
        # keeps its own resident table copy).
        dim_sem = (pltpu.CORE_PARALLEL,)
    else:
        dim_sem = ("parallel",)

    out_flat = pl.pallas_call(
        cml_kernel,
        out_shape=jax.ShapeDtypeStruct((b_pad, 3 * D), dt),
        grid_spec=pltpu.PrefetchScalarGridSpec(
            num_scalar_prefetch=3,
            grid=(num_tiles,),
            in_specs=[user_spec, item_spec],
            out_specs=out_spec,
        ),
        compiler_params=pltpu.CompilerParams(
            dimension_semantics=dim_sem,
            # Lane-padded resident tables (pipeline double-buffers them) plus
            # small output tiles; generous on v5e/v6e (128 MiB VMEM) and under
            # v7x's 64 MiB physical VMEM for the default 7947/25975 vocab.
            # For much larger vocabularies, single-buffer the tables
            # (pipeline_mode=pl.Buffered(1)) or gather from HBM manually.
            vmem_limit_bytes=48 * 1024 * 1024,
        ),
        cost_estimate=cost,
    )(uid, pid, nid, user_pad, item_pad)

    # (b_pad, 3D) row-major == torch.cat([user, pos, neg], axis=1), so the
    # reshape below reproduces torch's (B, D, 3) element order exactly.
    # NOTE: this final relayout (lane dim 3, padded 3->128) happens in XLA
    # outside the kernel and can cost more than the gather itself; consumers
    # that accept the flat (B, 3*D) layout should use out_flat[:B] directly.
    return out_flat[:B].reshape(B, D, 3)


def make_params(key, user_size, item_size, embed_dim):
    ku, ki = jax.random.split(key)
    user_emb = 0.01 * jax.random.normal(ku, (user_size, embed_dim), jnp.float32)
    item_emb = 0.01 * jax.random.normal(ki, (item_size, embed_dim), jnp.float32)
    # nn.Embedding(padding_idx=0): row 0 is zero at init.
    user_emb = user_emb.at[0].set(0.0)
    item_emb = item_emb.at[0].set(0.0)
    return user_emb, item_emb


if __name__ == "__main__":
    # Small-but-faithful config (module defaults are 7947 / 25975 / 20; the
    # vocabularies are shrunk for a quick demo, embed_dim kept at 20).
    user_size, item_size, embed_dim = 128, 256, 20
    batch = 8

    key = jax.random.PRNGKey(0)
    kparam, kdata = jax.random.split(key)
    user_emb, item_emb = make_params(kparam, user_size, item_size, embed_dim)

    ku, kp, kn = jax.random.split(kdata, 3)
    data = jnp.stack(
        [
            jax.random.randint(ku, (batch,), 0, user_size, jnp.int32),   # user id
            jax.random.randint(kp, (batch,), 0, item_size, jnp.int32),   # pos item
            jnp.zeros((batch,), jnp.int32),                              # unused col
            jax.random.randint(kn, (batch,), 0, item_size, jnp.int32),   # neg item
        ],
        axis=1,
    )

    out = cml_forward(data, user_emb, item_emb)
    out = jax.block_until_ready(out)

    # Pure-JAX reference for sanity.
    u = jnp.take(user_emb, data[:, 0], axis=0)
    p = jnp.take(item_emb, data[:, 1], axis=0)
    n = jnp.take(item_emb, data[:, 3], axis=0)
    ref = jnp.concatenate([u, p, n], axis=1).reshape(-1, embed_dim, 3)

    assert out.shape == (batch, embed_dim, 3)
    assert jnp.allclose(out, ref), "mismatch vs reference"
    print("KERNEL_OK")
</pallas_src>

<mosaic_0001>
module attributes {stable_mosaic.version = 11 : i64} {
  func.func @cml_kernel(%arg0: i32, %arg1: memref<8xi32, #tpu.memory_space<smem>>, %arg2: memref<8xi32, #tpu.memory_space<smem>>, %arg3: memref<8xi32, #tpu.memory_space<smem>>, %arg4: memref<128x60xf32, #tpu.memory_space<vmem>>, %arg5: memref<256x60xf32, #tpu.memory_space<vmem>>, %arg6: memref<8x60xf32, #tpu.memory_space<vmem>>) attributes {dimension_semantics = [#tpu.dimension_semantics<parallel>], iteration_bounds = array<i64: 1>, scalar_prefetch = 3 : i64, scratch_operands = 0 : i64, tpu.core_type = #tpu.core_type<tc>, window_params = [{pipeline_mode = #tpu.pipeline_mode<synchronous>, transform_indices = @transform_0, window_bounds = array<i64: 128, 60>}, {pipeline_mode = #tpu.pipeline_mode<synchronous>, transform_indices = @transform_1, window_bounds = array<i64: 256, 60>}, {transform_indices = @transform_2, window_bounds = array<i64: 8, 60>}]} {
    %c8_i32 = arith.constant 8 : i32
    %0 = arith.muli %arg0, %c8_i32 : i32
    %1 = tpu.iota {dimensions = array<i32: 1>} : vector<1x60xi32>
    %c20_i32 = arith.constant 20 : i32
    %2 = vector.broadcast %c20_i32 : i32 to vector<1x60xi32>
    %3 = arith.cmpi sge, %1, %2 : vector<1x60xi32>
    %c40_i32 = arith.constant 40 : i32
    %4 = vector.broadcast %c40_i32 : i32 to vector<1x60xi32>
    %5 = arith.cmpi slt, %1, %4 : vector<1x60xi32>
    %6 = arith.andi %3, %5 : vector<1x60xi1>
    %c40_i32_0 = arith.constant 40 : i32
    %7 = vector.broadcast %c40_i32_0 : i32 to vector<1x60xi32>
    %8 = arith.cmpi sge, %1, %7 : vector<1x60xi32>
    %c0_i32 = arith.constant 0 : i32
    %9 = arith.addi %0, %c0_i32 : i32
    %10 = arith.index_cast %9 : i32 to index
    %11 = memref.load %arg1[%10] : memref<8xi32, #tpu.memory_space<smem>>
    %12 = arith.addi %0, %c0_i32 : i32
    %13 = arith.index_cast %12 : i32 to index
    %14 = memref.load %arg2[%13] : memref<8xi32, #tpu.memory_space<smem>>
    %15 = arith.addi %0, %c0_i32 : i32
    %16 = arith.index_cast %15 : i32 to index
    %17 = memref.load %arg3[%16] : memref<8xi32, #tpu.memory_space<smem>>
    %18 = arith.index_cast %11 : i32 to index
    %c0 = arith.constant 0 : index
    %19 = vector.load %arg4[%18, %c0] : memref<128x60xf32, #tpu.memory_space<vmem>>, vector<1x60xf32>
    %20 = arith.index_cast %14 : i32 to index
    %c0_1 = arith.constant 0 : index
    %21 = vector.load %arg5[%20, %c0_1] : memref<256x60xf32, #tpu.memory_space<vmem>>, vector<1x60xf32>
    %22 = arith.index_cast %17 : i32 to index
    %c0_2 = arith.constant 0 : index
    %23 = vector.load %arg5[%22, %c0_2] : memref<256x60xf32, #tpu.memory_space<vmem>>, vector<1x60xf32>
    %cst = arith.constant 0.000000e+00 : f32
    %24 = vector.broadcast %cst : f32 to vector<1x60xf32>
    %25 = arith.select %6, %21, %24 : vector<1x60xi1>, vector<1x60xf32>
    %26 = arith.addf %19, %25 : vector<1x60xf32>
    %cst_3 = arith.constant 0.000000e+00 : f32
    %27 = vector.broadcast %cst_3 : f32 to vector<1x60xf32>
    %28 = arith.select %8, %23, %27 : vector<1x60xi1>, vector<1x60xf32>
    %29 = arith.addf %26, %28 : vector<1x60xf32>
    %30 = arith.index_cast %c0_i32 : i32 to index
    %c0_4 = arith.constant 0 : index
    %31 = vector.load %arg6[%30, %c0_4] : memref<8x60xf32, #tpu.memory_space<vmem>>, vector<1x60xf32>
    tpu.vector_store %arg6[%30, %c0_4], %29 {strides = array<i32>} : memref<8x60xf32, #tpu.memory_space<vmem>>, vector<1x60xf32>,
    %c1_i32 = arith.constant 1 : i32
    %32 = arith.addi %0, %c1_i32 : i32
    %33 = arith.index_cast %32 : i32 to index
    %34 = memref.load %arg1[%33] : memref<8xi32, #tpu.memory_space<smem>>
    %35 = arith.addi %0, %c1_i32 : i32
    %36 = arith.index_cast %35 : i32 to index
    %37 = memref.load %arg2[%36] : memref<8xi32, #tpu.memory_space<smem>>
    %38 = arith.addi %0, %c1_i32 : i32
    %39 = arith.index_cast %38 : i32 to index
    %40 = memref.load %arg3[%39] : memref<8xi32, #tpu.memory_space<smem>>
    %41 = arith.index_cast %34 : i32 to index
    %c0_5 = arith.constant 0 : index
    %42 = vector.load %arg4[%41, %c0_5] : memref<128x60xf32, #tpu.memory_space<vmem>>, vector<1x60xf32>
    %43 = arith.index_cast %37 : i32 to index
    %c0_6 = arith.constant 0 : index
    %44 = vector.load %arg5[%43, %c0_6] : memref<256x60xf32, #tpu.memory_space<vmem>>, vector<1x60xf32>
    %45 = arith.index_cast %40 : i32 to index
    %c0_7 = arith.constant 0 : index
    %46 = vector.load %arg5[%45, %c0_7] : memref<256x60xf32, #tpu.memory_space<vmem>>, vector<1x60xf32>
    %cst_8 = arith.constant 0.000000e+00 : f32
    %47 = vector.broadcast %cst_8 : f32 to vector<1x60xf32>
    %48 = arith.select %6, %44, %47 : vector<1x60xi1>, vector<1x60xf32>
    %49 = arith.addf %42, %48 : vector<1x60xf32>
    %cst_9 = arith.constant 0.000000e+00 : f32
    %50 = vector.broadcast %cst_9 : f32 to vector<1x60xf32>
    %51 = arith.select %8, %46, %50 : vector<1x60xi1>, vector<1x60xf32>
    %52 = arith.addf %49, %51 : vector<1x60xf32>
    %53 = arith.index_cast %c1_i32 : i32 to index
    %c0_10 = arith.constant 0 : index
    %54 = vector.load %arg6[%53, %c0_10] : memref<8x60xf32, #tpu.memory_space<vmem>>, vector<1x60xf32>
    tpu.vector_store %arg6[%53, %c0_10], %52 {strides = array<i32>} : memref<8x60xf32, #tpu.memory_space<vmem>>, vector<1x60xf32>,
    %c2_i32 = arith.constant 2 : i32
    %55 = arith.addi %0, %c2_i32 : i32
    %56 = arith.index_cast %55 : i32 to index
    %57 = memref.load %arg1[%56] : memref<8xi32, #tpu.memory_space<smem>>
    %58 = arith.addi %0, %c2_i32 : i32
    %59 = arith.index_cast %58 : i32 to index
    %60 = memref.load %arg2[%59] : memref<8xi32, #tpu.memory_space<smem>>
    %61 = arith.addi %0, %c2_i32 : i32
    %62 = arith.index_cast %61 : i32 to index
    %63 = memref.load %arg3[%62] : memref<8xi32, #tpu.memory_space<smem>>
    %64 = arith.index_cast %57 : i32 to index
    %c0_11 = arith.constant 0 : index
    %65 = vector.load %arg4[%64, %c0_11] : memref<128x60xf32, #tpu.memory_space<vmem>>, vector<1x60xf32>
    %66 = arith.index_cast %60 : i32 to index
    %c0_12 = arith.constant 0 : index
    %67 = vector.load %arg5[%66, %c0_12] : memref<256x60xf32, #tpu.memory_space<vmem>>, vector<1x60xf32>
    %68 = arith.index_cast %63 : i32 to index
    %c0_13 = arith.constant 0 : index
    %69 = vector.load %arg5[%68, %c0_13] : memref<256x60xf32, #tpu.memory_space<vmem>>, vector<1x60xf32>
    %cst_14 = arith.constant 0.000000e+00 : f32
    %70 = vector.broadcast %cst_14 : f32 to vector<1x60xf32>
    %71 = arith.select %6, %67, %70 : vector<1x60xi1>, vector<1x60xf32>
    %72 = arith.addf %65, %71 : vector<1x60xf32>
    %cst_15 = arith.constant 0.000000e+00 : f32
    %73 = vector.broadcast %cst_15 : f32 to vector<1x60xf32>
    %74 = arith.select %8, %69, %73 : vector<1x60xi1>, vector<1x60xf32>
    %75 = arith.addf %72, %74 : vector<1x60xf32>
    %76 = arith.index_cast %c2_i32 : i32 to index
    %c0_16 = arith.constant 0 : index
    %77 = vector.load %arg6[%76, %c0_16] : memref<8x60xf32, #tpu.memory_space<vmem>>, vector<1x60xf32>
    tpu.vector_store %arg6[%76, %c0_16], %75 {strides = array<i32>} : memref<8x60xf32, #tpu.memory_space<vmem>>, vector<1x60xf32>,
    %c3_i32 = arith.constant 3 : i32
    %78 = arith.addi %0, %c3_i32 : i32
    %79 = arith.index_cast %78 : i32 to index
    %80 = memref.load %arg1[%79] : memref<8xi32, #tpu.memory_space<smem>>
    %81 = arith.addi %0, %c3_i32 : i32
    %82 = arith.index_cast %81 : i32 to index
    %83 = memref.load %arg2[%82] : memref<8xi32, #tpu.memory_space<smem>>
    %84 = arith.addi %0, %c3_i32 : i32
    %85 = arith.index_cast %84 : i32 to index
    %86 = memref.load %arg3[%85] : memref<8xi32, #tpu.memory_space<smem>>
    %87 = arith.index_cast %80 : i32 to index
    %c0_17 = arith.constant 0 : index
    %88 = vector.load %arg4[%87, %c0_17] : memref<128x60xf32, #tpu.memory_space<vmem>>, vector<1x60xf32>
    %89 = arith.index_cast %83 : i32 to index
    %c0_18 = arith.constant 0 : index
    %90 = vector.load %arg5[%89, %c0_18] : memref<256x60xf32, #tpu.memory_space<vmem>>, vector<1x60xf32>
    %91 = arith.index_cast %86 : i32 to index
    %c0_19 = arith.constant 0 : index
    %92 = vector.load %arg5[%91, %c0_19] : memref<256x60xf32, #tpu.memory_space<vmem>>, vector<1x60xf32>
    %cst_20 = arith.constant 0.000000e+00 : f32
    %93 = vector.broadcast %cst_20 : f32 to vector<1x60xf32>
    %94 = arith.select %6, %90, %93 : vector<1x60xi1>, vector<1x60xf32>
    %95 = arith.addf %88, %94 : vector<1x60xf32>
    %cst_21 = arith.constant 0.000000e+00 : f32
    %96 = vector.broadcast %cst_21 : f32 to vector<1x60xf32>
    %97 = arith.select %8, %92, %96 : vector<1x60xi1>, vector<1x60xf32>
    %98 = arith.addf %95, %97 : vector<1x60xf32>
    %99 = arith.index_cast %c3_i32 : i32 to index
    %c0_22 = arith.constant 0 : index
    %100 = vector.load %arg6[%99, %c0_22] : memref<8x60xf32, #tpu.memory_space<vmem>>, vector<1x60xf32>
    tpu.vector_store %arg6[%99, %c0_22], %98 {strides = array<i32>} : memref<8x60xf32, #tpu.memory_space<vmem>>, vector<1x60xf32>,
    %c4_i32 = arith.constant 4 : i32
    %101 = arith.addi %0, %c4_i32 : i32
    %102 = arith.index_cast %101 : i32 to index
    %103 = memref.load %arg1[%102] : memref<8xi32, #tpu.memory_space<smem>>
    %104 = arith.addi %0, %c4_i32 : i32
    %105 = arith.index_cast %104 : i32 to index
    %106 = memref.load %arg2[%105] : memref<8xi32, #tpu.memory_space<smem>>
    %107 = arith.addi %0, %c4_i32 : i32
    %108 = arith.index_cast %107 : i32 to index
    %109 = memref.load %arg3[%108] : memref<8xi32, #tpu.memory_space<smem>>
    %110 = arith.index_cast %103 : i32 to index
    %c0_23 = arith.constant 0 : index
    %111 = vector.load %arg4[%110, %c0_23] : memref<128x60xf32, #tpu.memory_space<vmem>>, vector<1x60xf32>
    %112 = arith.index_cast %106 : i32 to index
    %c0_24 = arith.constant 0 : index
    %113 = vector.load %arg5[%112, %c0_24] : memref<256x60xf32, #tpu.memory_space<vmem>>, vector<1x60xf32>
    %114 = arith.index_cast %109 : i32 to index
    %c0_25 = arith.constant 0 : index
    %115 = vector.load %arg5[%114, %c0_25] : memref<256x60xf32, #tpu.memory_space<vmem>>, vector<1x60xf32>
    %cst_26 = arith.constant 0.000000e+00 : f32
    %116 = vector.broadcast %cst_26 : f32 to vector<1x60xf32>
    %117 = arith.select %6, %113, %116 : vector<1x60xi1>, vector<1x60xf32>
    %118 = arith.addf %111, %117 : vector<1x60xf32>
    %cst_27 = arith.constant 0.000000e+00 : f32
    %119 = vector.broadcast %cst_27 : f32 to vector<1x60xf32>
    %120 = arith.select %8, %115, %119 : vector<1x60xi1>, vector<1x60xf32>
    %121 = arith.addf %118, %120 : vector<1x60xf32>
    %122 = arith.index_cast %c4_i32 : i32 to index
    %c0_28 = arith.constant 0 : index
    %123 = vector.load %arg6[%122, %c0_28] : memref<8x60xf32, #tpu.memory_space<vmem>>, vector<1x60xf32>
    tpu.vector_store %arg6[%122, %c0_28], %121 {strides = array<i32>} : memref<8x60xf32, #tpu.memory_space<vmem>>, vector<1x60xf32>,
    %c5_i32 = arith.constant 5 : i32
    %124 = arith.addi %0, %c5_i32 : i32
    %125 = arith.index_cast %124 : i32 to index
    %126 = memref.load %arg1[%125] : memref<8xi32, #tpu.memory_space<smem>>
    %127 = arith.addi %0, %c5_i32 : i32
    %128 = arith.index_cast %127 : i32 to index
    %129 = memref.load %arg2[%128] : memref<8xi32, #tpu.memory_space<smem>>
    %130 = arith.addi %0, %c5_i32 : i32
    %131 = arith.index_cast %130 : i32 to index
    %132 = memref.load %arg3[%131] : memref<8xi32, #tpu.memory_space<smem>>
    %133 = arith.index_cast %126 : i32 to index
    %c0_29 = arith.constant 0 : index
    %134 = vector.load %arg4[%133, %c0_29] : memref<128x60xf32, #tpu.memory_space<vmem>>, vector<1x60xf32>
    %135 = arith.index_cast %129 : i32 to index
    %c0_30 = arith.constant 0 : index
    %136 = vector.load %arg5[%135, %c0_30] : memref<256x60xf32, #tpu.memory_space<vmem>>, vector<1x60xf32>
    %137 = arith.index_cast %132 : i32 to index
    %c0_31 = arith.constant 0 : index
    %138 = vector.load %arg5[%137, %c0_31] : memref<256x60xf32, #tpu.memory_space<vmem>>, vector<1x60xf32>
    %cst_32 = arith.constant 0.000000e+00 : f32
    %139 = vector.broadcast %cst_32 : f32 to vector<1x60xf32>
    %140 = arith.select %6, %136, %139 : vector<1x60xi1>, vector<1x60xf32>
    %141 = arith.addf %134, %140 : vector<1x60xf32>
    %cst_33 = arith.constant 0.000000e+00 : f32
    %142 = vector.broadcast %cst_33 : f32 to vector<1x60xf32>
    %143 = arith.select %8, %138, %142 : vector<1x60xi1>, vector<1x60xf32>
    %144 = arith.addf %141, %143 : vector<1x60xf32>
    %145 = arith.index_cast %c5_i32 : i32 to index
    %c0_34 = arith.constant 0 : index
    %146 = vector.load %arg6[%145, %c0_34] : memref<8x60xf32, #tpu.memory_space<vmem>>, vector<1x60xf32>
    tpu.vector_store %arg6[%145, %c0_34], %144 {strides = array<i32>} : memref<8x60xf32, #tpu.memory_space<vmem>>, vector<1x60xf32>,
    %c6_i32 = arith.constant 6 : i32
    %147 = arith.addi %0, %c6_i32 : i32
    %148 = arith.index_cast %147 : i32 to index
    %149 = memref.load %arg1[%148] : memref<8xi32, #tpu.memory_space<smem>>
    %150 = arith.addi %0, %c6_i32 : i32
    %151 = arith.index_cast %150 : i32 to index
    %152 = memref.load %arg2[%151] : memref<8xi32, #tpu.memory_space<smem>>
    %153 = arith.addi %0, %c6_i32 : i32
    %154 = arith.index_cast %153 : i32 to index
    %155 = memref.load %arg3[%154] : memref<8xi32, #tpu.memory_space<smem>>
    %156 = arith.index_cast %149 : i32 to index
    %c0_35 = arith.constant 0 : index
    %157 = vector.load %arg4[%156, %c0_35] : memref<128x60xf32, #tpu.memory_space<vmem>>, vector<1x60xf32>
    %158 = arith.index_cast %152 : i32 to index
    %c0_36 = arith.constant 0 : index
    %159 = vector.load %arg5[%158, %c0_36] : memref<256x60xf32, #tpu.memory_space<vmem>>, vector<1x60xf32>
    %160 = arith.index_cast %155 : i32 to index
    %c0_37 = arith.constant 0 : index
    %161 = vector.load %arg5[%160, %c0_37] : memref<256x60xf32, #tpu.memory_space<vmem>>, vector<1x60xf32>
    %cst_38 = arith.constant 0.000000e+00 : f32
    %162 = vector.broadcast %cst_38 : f32 to vector<1x60xf32>
    %163 = arith.select %6, %159, %162 : vector<1x60xi1>, vector<1x60xf32>
    %164 = arith.addf %157, %163 : vector<1x60xf32>
    %cst_39 = arith.constant 0.000000e+00 : f32
    %165 = vector.broadcast %cst_39 : f32 to vector<1x60xf32>
    %166 = arith.select %8, %161, %165 : vector<1x60xi1>, vector<1x60xf32>
    %167 = arith.addf %164, %166 : vector<1x60xf32>
    %168 = arith.index_cast %c6_i32 : i32 to index
    %c0_40 = arith.constant 0 : index
    %169 = vector.load %arg6[%168, %c0_40] : memref<8x60xf32, #tpu.memory_space<vmem>>, vector<1x60xf32>
    tpu.vector_store %arg6[%168, %c0_40], %167 {strides = array<i32>} : memref<8x60xf32, #tpu.memory_space<vmem>>, vector<1x60xf32>,
    %c7_i32 = arith.constant 7 : i32
    %170 = arith.addi %0, %c7_i32 : i32
    %171 = arith.index_cast %170 : i32 to index
    %172 = memref.load %arg1[%171] : memref<8xi32, #tpu.memory_space<smem>>
    %173 = arith.addi %0, %c7_i32 : i32
    %174 = arith.index_cast %173 : i32 to index
    %175 = memref.load %arg2[%174] : memref<8xi32, #tpu.memory_space<smem>>
    %176 = arith.addi %0, %c7_i32 : i32
    %177 = arith.index_cast %176 : i32 to index
    %178 = memref.load %arg3[%177] : memref<8xi32, #tpu.memory_space<smem>>
    %179 = arith.index_cast %172 : i32 to index
    %c0_41 = arith.constant 0 : index
    %180 = vector.load %arg4[%179, %c0_41] : memref<128x60xf32, #tpu.memory_space<vmem>>, vector<1x60xf32>
    %181 = arith.index_cast %175 : i32 to index
    %c0_42 = arith.constant 0 : index
    %182 = vector.load %arg5[%181, %c0_42] : memref<256x60xf32, #tpu.memory_space<vmem>>, vector<1x60xf32>
    %183 = arith.index_cast %178 : i32 to index
    %c0_43 = arith.constant 0 : index
    %184 = vector.load %arg5[%183, %c0_43] : memref<256x60xf32, #tpu.memory_space<vmem>>, vector<1x60xf32>
    %cst_44 = arith.constant 0.000000e+00 : f32
    %185 = vector.broadcast %cst_44 : f32 to vector<1x60xf32>
    %186 = arith.select %6, %182, %185 : vector<1x60xi1>, vector<1x60xf32>
    %187 = arith.addf %180, %186 : vector<1x60xf32>
    %cst_45 = arith.constant 0.000000e+00 : f32
    %188 = vector.broadcast %cst_45 : f32 to vector<1x60xf32>
    %189 = arith.select %8, %184, %188 : vector<1x60xi1>, vector<1x60xf32>
    %190 = arith.addf %187, %189 : vector<1x60xf32>
    %191 = arith.index_cast %c7_i32 : i32 to index
    %c0_46 = arith.constant 0 : index
    %192 = vector.load %arg6[%191, %c0_46] : memref<8x60xf32, #tpu.memory_space<vmem>>, vector<1x60xf32>
    tpu.vector_store %arg6[%191, %c0_46], %190 {strides = array<i32>} : memref<8x60xf32, #tpu.memory_space<vmem>>, vector<1x60xf32>,
    %c8_i32_47 = arith.constant 8 : i32
    return
  }
  func.func @transform_0(%arg0: i32, %arg1: memref<8xi32, #tpu.memory_space<smem>>, %arg2: memref<8xi32, #tpu.memory_space<smem>>, %arg3: memref<8xi32, #tpu.memory_space<smem>>) -> (i32, i32) {
    %c0_i32 = arith.constant 0 : i32
    %c0_i32_0 = arith.constant 0 : i32
    %c0_i32_1 = arith.constant 0 : i32
    return %c0_i32, %c0_i32_0 : i32, i32
  }
  func.func @transform_1(%arg0: i32, %arg1: memref<8xi32, #tpu.memory_space<smem>>, %arg2: memref<8xi32, #tpu.memory_space<smem>>, %arg3: memref<8xi32, #tpu.memory_space<smem>>) -> (i32, i32) {
    %c0_i32 = arith.constant 0 : i32
    %c0_i32_0 = arith.constant 0 : i32
    %c0_i32_1 = arith.constant 0 : i32
    return %c0_i32, %c0_i32_0 : i32, i32
  }
  func.func @transform_2(%arg0: i32, %arg1: memref<8xi32, #tpu.memory_space<smem>>, %arg2: memref<8xi32, #tpu.memory_space<smem>>, %arg3: memref<8xi32, #tpu.memory_space<smem>>) -> (i32, i32) {
    %c0_i32 = arith.constant 0 : i32
    %c0_i32_0 = arith.constant 0 : i32
    return %arg0, %c0_i32 : i32, i32
  }
}

</mosaic_0001>

<bundles_post_ra>
// kernel: tpu_custom_call.1
= control target key start
LH: loop header
LB: loop body
LE: loop exit
PB: predicated region body
PF: predicated region fallthrough
CT: control target
= control target key end

     0   :  { %s487_s0 = inlined_call_operand.vmem [shape: s32[8], index: 0, kind: input, shape index: {}]   ;;  %s488_s3 = inlined_call_operand.vmem [shape: f32[128,60], index: 3, kind: input, shape index: {}]   ;;  %s489_s4 = inlined_call_operand.vmem [shape: f32[256,60], index: 4, kind: input, shape index: {}]   ;;  %s490_s5 = inlined_call_operand.hbm [shape: f32[8,60], index: 5, kind: output, shape index: {}]   ;;  %s491_s1 = inlined_call_operand.vmem [shape: s32[8], index: 1, kind: input, shape index: {}]   ;;  %s492_s2 = inlined_call_operand.vmem [shape: s32[8], index: 2, kind: input, shape index: {}]  }
   0x1   :  { %s10_s20 = sshll.u32 %s487_s0, 4  ;;  %s14_s23 = sshll.u32 %s491_s1, 4  ;;  %s11_s20 = int_to_ptr.vmem [resolvable:$true] %s10_s20  ;;  %s15_s23 = int_to_ptr.vmem [resolvable:$true] %s14_s23 }
   0x2   :  { %s219_s24 = scalar_lea.vmem %s11_s20, 16  ;;  %p224_p1 = scmp.lt.s32.totalorder %s11_s20, %s11_s20 }
   0x3   :  { %p220_p0 = scmp.ne.s32.totalorder %s11_s20, %s219_s24  ;;  %p225_p2 = scmp.lt.s32.totalorder %s219_s24, %s219_s24 }
   0x5   :  { %p226_p3 = por %p225_p2, %p224_p1 }
   0x7   :  { %p227_p4 = pnand %p226_p3, %p220_p0 }
   0x9   :  { %230 = shalt.err (!%p227_p4)  }
   0xa   :  { %s281_s25 = smov [#allocation3]   ;;  %s231_s26 = scalar_lea.vmem %s15_s23, 16 }
   0xb   :  { %13 = dma.vmem_to_smem %s11_s20, 16, %s281_s25, [#allocation2] }
   0xc   :  { %p232_p5 = scmp.ne.s32.totalorder %s15_s23, %s231_s26  ;;  %p236_p6 = scmp.lt.s32.totalorder %s15_s23, %s15_s23 }
   0xd   :  { %p237_p7 = scmp.lt.s32.totalorder %s231_s26, %s231_s26 }
   0xf   :  { %p238_p8 = por %p237_p7, %p236_p6 }
  0x11   :  { %p239_p9 = pnand %p238_p8, %p232_p5 }
  0x13   :  { %242 = shalt.err (!%p239_p9)  }
  0x14   :  { %s282_s0 = smov [#allocation4]   ;;  %s18_s28 = sshll.u32 %s492_s2, 4  ;;  %s19_s28 = int_to_ptr.vmem [resolvable:$true] %s18_s28 }
  0x15   :  { %17 = dma.vmem_to_smem %s15_s23, 16, %s282_s0, [#allocation2] }
  0x16   :  { %s243_s29 = scalar_lea.vmem %s19_s28, 16  ;;  %p248_p11 = scmp.lt.s32.totalorder %s19_s28, %s19_s28 }
  0x17   :  { %p244_p10 = scmp.ne.s32.totalorder %s19_s28, %s243_s29  ;;  %p249_p12 = scmp.lt.s32.totalorder %s243_s29, %s243_s29 }
  0x19   :  { %p250_p13 = por %p249_p12, %p248_p11 }
  0x1b   :  { %p251_p0 = pnand %p250_p13, %p244_p10 }
  0x1d   :  { %254 = shalt.err (!%p251_p0)  }
  0x1e   :  { %s283_s30 = smov [#allocation5]  }
  0x1f   :  { %21 = dma.vmem_to_smem %s19_s28, 16, %s283_s30, [#allocation2] }
  0x20   :  { %277 = dma.done.wait [#allocation2], 48 }
  0x21   :  { %278 = vsyncadd [#allocation2], 4294967248 }
  0x22   :  { %23 = sfence }
  0x23   :  { %v30_v0 = vlaneseq  ;;  %s36_s6 = sld [smem:[#allocation3]]  ;;  %s194_s9 = sld [smem:[#allocation3 + $0x1]] }
  0x24   :  { %s37_s7 = sld [smem:[#allocation4]] }
  0x25   :  { %s38_s8 = sld [smem:[#allocation5]] }
  0x26   :  { %24 = vsyncpa [#allocation7], 0  ;;  %v324_v1 = vand.u32 127, %v30_v0  ;;  %s195_s2 = sld [smem:[#allocation4 + $0x1]]  ;;  %s326_s11 = sld [smem:[#allocation3 + $0x2]]  ;;  %vm49_vm4 = vcmask 483328  }
  0x27   :  { %s196_s10 = sld [smem:[#allocation5 + $0x1]]  ;;  %s328_s12 = sld [smem:[#allocation4 + $0x2]] }
  0x28   :  { %vm32_vm0 = vcmp.ge.s32.totalorder %v324_v1, 20  ;;  %vm33_vm1 = vcmp.lt.s32.totalorder %v324_v1, 40  ;;  %s332_s13 = sld [smem:[#allocation5 + $0x2]]  ;;  %s338_s14 = sld [smem:[#allocation3 + $0x3]]  ;;  %vm35_vm3 = vcmp.ge.s32.totalorder %v324_v1, 40 }
  0x29   :  { %vm334_vm2 = vmand %vm32_vm0, %vm33_vm1  ;;  %s340_s15 = sld [smem:[#allocation4 + $0x3]]  ;;  %s39_s18 = scalar_lea.vmem %s488_s3, %s36_s6 }
  0x2a   :  { %s41_s21 = scalar_lea.vmem %s489_s4, %s37_s7  ;;  %v40_v3 = vld [vmem:[%s39_s18] sm:$0x1]  ;;  %s55_s0 = scalar_lea.vmem %s488_s3, %s194_s9 }
  0x2b   :  { %v42_v4 = vld [vmem:[%s41_s21] sm:$0x1]  ;;  %s43_s24 = scalar_lea.vmem %s489_s4, %s38_s8  ;;  %s204_s25 = sld [smem:[#allocation4 + $0x4]] }
  0x2c   :  { %v44_v5 = vld [vmem:[%s43_s24] sm:$0x1]  ;;  %v45_v6 = vsel %vm334_vm2, %v42_v4, 0.0  ;;  %s57_s28 = scalar_lea.vmem %s489_s4, %s195_s2  ;;  %s70_s9 = scalar_lea.vmem %s488_s3, %s326_s11 }
  0x2d   :  { %v56_v7 = vld [vmem:[%s55_s0] sm:$0x1]  ;;  %s59_s6 = scalar_lea.vmem %s489_s4, %s196_s10  ;;  %v46_v8 = vadd.f32 %v45_v6, %v40_v3  ;;  %v47_v9 = vsel %vm35_vm3, %v44_v5, 0.0  ;;  %s72_s2 = scalar_lea.vmem %s489_s4, %s328_s12 }
  0x2e   :  { %v58_v10 = vld [vmem:[%s57_s28] sm:$0x1]  ;;  %s74_s19 = scalar_lea.vmem %s489_s4, %s332_s13  ;;  %s202_s11 = sld [smem:[#allocation5 + $0x3]] }
  0x2f   :  { %v60_v11 = vld [vmem:[%s59_s6] sm:$0x1]  ;;  %v61_v12 = vsel %vm334_vm2, %v58_v10, 0.0  ;;  %v48_v16 = vadd.f32 %v47_v9, %v46_v8  ;;  %s85_s21 = scalar_lea.vmem %s488_s3, %s338_s14  ;;  %s87_s13 = scalar_lea.vmem %s489_s4, %s340_s15 }
  0x30   :  { %v63_v13 = vsel %vm35_vm3, %v60_v11, 0.0  ;;  %v71_v14 = vld [vmem:[%s70_s9] sm:$0x1]  ;;  %v62_v17 = vadd.f32 %v61_v12, %v56_v7  ;;  %s203_s24 = sld [smem:[#allocation3 + $0x4]]  ;;  %s206_s14 = sld [smem:[#allocation3 + $0x5]] }
  0x31   :  { %v73_v15 = vld [vmem:[%s72_s2] sm:$0x1]  ;;  %50 = vst.msk [vmem:[#allocation6] sm:$0x1] %vm49_vm4, %v48_v16  ;;  %s205_s26 = sld [smem:[#allocation5 + $0x4]]  ;;  %s207_s0 = sld [smem:[#allocation4 + $0x5]] }
  0x32   :  { %v75_v18 = vld [vmem:[%s74_s19] sm:$0x1]  ;;  %v76_v19 = vsel %vm334_vm2, %v73_v15, 0.0  ;;  %v64_v23 = vadd.f32 %v63_v13, %v62_v17  ;;  %s208_s1 = sld [smem:[#allocation5 + $0x5]]  ;;  %s397_s27 = sld [smem:[#allocation3 + $0x6]] }
  0x33   :  { %v77_v20 = vadd.f32 %v76_v19, %v71_v14  ;;  %v78_v21 = vsel %vm35_vm3, %v75_v18, 0.0  ;;  %v86_v22 = vld [vmem:[%s85_s21] sm:$0x1]  ;;  %s400_s15 = sld [smem:[#allocation4 + $0x6]]  ;;  %s407_s7 = sld [smem:[#allocation3 + $0x7]] }
  0x34   :  { %v88_v24 = vld [vmem:[%s87_s13] sm:$0x1]  ;;  %65 = vst.msk [vmem:[#allocation6 + $0x1] sm:$0x1] %vm49_vm4, %v64_v23  ;;  %s402_s28 = sld [smem:[#allocation5 + $0x6]]  ;;  %s89_s6 = scalar_lea.vmem %s489_s4, %s202_s11 }
  0x35   :  { %v79_v25 = vadd.f32 %v78_v21, %v77_v20  ;;  %v91_v26 = vsel %vm334_vm2, %v88_v24, 0.0  ;;  %v90_v28 = vld [vmem:[%s89_s6] sm:$0x1]  ;;  %s412_s17 = sld [smem:[#allocation4 + $0x7]]  ;;  %s102_s18 = scalar_lea.vmem %s489_s4, %s204_s25 }
  0x36   :  { %v92_v27 = vadd.f32 %v91_v26, %v86_v22  ;;  %s100_s16 = scalar_lea.vmem %s488_s3, %s203_s24  ;;  %v93_v29 = vsel %vm35_vm3, %v90_v28, 0.0  ;;  %v103_v32 = vld [vmem:[%s102_s18] sm:$0x1]  ;;  %s115_s22 = scalar_lea.vmem %s488_s3, %s206_s14 }
  0x37   :  { %80 = vst.msk [vmem:[#allocation6 + $0x2] sm:$0x1] %vm49_vm4, %v79_v25  ;;  %v101_v30 = vld [vmem:[%s100_s16] sm:$0x1]  ;;  %s104_s12 = scalar_lea.vmem %s489_s4, %s205_s26  ;;  %s117_s24 = scalar_lea.vmem %s489_s4, %s207_s0  ;;  %v106_v34 = vsel %vm334_vm2, %v103_v32, 0.0 }
  0x38   :  { %v94_v31 = vadd.f32 %v93_v29, %v92_v27  ;;  %v105_v33 = vld [vmem:[%s104_s12] sm:$0x1]  ;;  %s119_s29 = scalar_lea.vmem %s489_s4, %s208_s1  ;;  %s130_s14 = scalar_lea.vmem %s488_s3, %s397_s27  ;;  %v107_v38 = vadd.f32 %v106_v34, %v101_v30 }
  0x39   :  { %v108_v35 = vsel %vm35_vm3, %v105_v33, 0.0  ;;  %v116_v36 = vld [vmem:[%s115_s22] sm:$0x1]  ;;  %s132_s9 = scalar_lea.vmem %s489_s4, %s400_s15  ;;  %s145_s18 = scalar_lea.vmem %s488_s3, %s407_s7 }
  0x3a   :  { %v118_v37 = vld [vmem:[%s117_s24] sm:$0x1]  ;;  %95 = vst.msk [vmem:[#allocation6 + $0x3] sm:$0x1] %vm49_vm4, %v94_v31  ;;  %s134_s1 = scalar_lea.vmem %s489_s4, %s402_s28  ;;  %v109_v46 = vadd.f32 %v108_v35, %v107_v38  ;;  %s214_s15 = sld [smem:[#allocation5 + $0x7]] }
  0x3b   :  { %v120_v39 = vld [vmem:[%s119_s29] sm:$0x1]  ;;  %v121_v40 = vsel %vm334_vm2, %v118_v37, 0.0  ;;  %s147_s11 = scalar_lea.vmem %s489_s4, %s412_s17  ;;  %s284_s17 = smov [#allocation6]  }
  0x3c   :  { %v131_v41 = vld [vmem:[%s130_s14] sm:$0x1]  ;;  %v122_v42 = vadd.f32 %v121_v40, %v116_v36  ;;  %v123_v43 = vsel %vm35_vm3, %v120_v39, 0.0  ;;  %110 = vst.msk [vmem:[#allocation6 + $0x4] sm:$0x1] %vm49_vm4, %v109_v46  ;;  %s162_s20 = sshll.u32 %s284_s17, 4  ;;  %s163_s20 = int_to_ptr.vmem [resolvable:$true] %s162_s20 }
  0x3d   :  { %v133_v44 = vld [vmem:[%s132_s9] sm:$0x1]  ;;  %s255_s21 = scalar_lea.vmem %s163_s20, 128  ;;  %p260_p2 = scmp.lt.s32.totalorder %s163_s20, %s163_s20 }
  0x3e   :  { %v135_v45 = vld [vmem:[%s134_s1] sm:$0x1]  ;;  %v136_v47 = vsel %vm334_vm2, %v133_v44, 0.0  ;;  %v124_v49 = vadd.f32 %v123_v43, %v122_v42  ;;  %p256_p1 = scmp.ne.s32.totalorder %s163_s20, %s255_s21  ;;  %p261_p3 = scmp.lt.s32.totalorder %s255_s21, %s255_s21 }
  0x3f   :  { %v138_v48 = vsel %vm35_vm3, %v135_v45, 0.0  ;;  %v137_v50 = vadd.f32 %v136_v47, %v131_v41  ;;  %v148_v51 = vld [vmem:[%s147_s11] sm:$0x1] }
  0x40   :  { %v146_v52 = vld [vmem:[%s145_s18] sm:$0x1]  ;;  %v151_v53 = vsel %vm334_vm2, %v148_v51, 0.0  ;;  %125 = vst.msk [vmem:[#allocation6 + $0x5] sm:$0x1] %vm49_vm4, %v124_v49  ;;  %s149_s12 = scalar_lea.vmem %s489_s4, %s214_s15  ;;  %p262_p4 = por %p261_p3, %p260_p2 }
  0x41   :  { %v139_v54 = vadd.f32 %v138_v48, %v137_v50  ;;  %v152_v55 = vadd.f32 %v151_v53, %v146_v52  ;;  %v150_v56 = vld [vmem:[%s149_s12] sm:$0x1] }
  0x42   :  { %v153_v57 = vsel %vm35_vm3, %v150_v56, 0.0  ;;  %p263_p5 = pnand %p262_p4, %p256_p1 }
  0x43   :  { %140 = vst.msk [vmem:[#allocation6 + $0x6] sm:$0x1] %vm49_vm4, %v139_v54  ;;  %v154_v58 = vadd.f32 %v153_v57, %v152_v55 }
  0x45   :  { %155 = vst.msk [vmem:[#allocation6 + $0x7] sm:$0x1] %vm49_vm4, %v154_v58 }
  0x46   :  { %266 = shalt.err (!%p263_p5)
}
  0x47   :  { %s267_s4 = scalar_lea.hbm %s490_s5, 128 }
  0x48   :  { %p268_p6 = scmp.ne.s32.totalorder %s490_s5, %s267_s4  ;;  %p271_p7 = scmp.lt.u32.totalorder %s267_s4, %s490_s5 }
  0x4a   :  { %p273_p8 = pnand %p271_p7, %p268_p6 }
  0x4c   :  { %276 = shalt.err (!%p273_p8)
}
  0x4d   :  { %165 = dma.vmem_to_hbm [thread:$0]  %s163_s20, 128, %s490_s5, [#allocation7]  }
  0x4e   :  { %279 = dma.done.wait [#allocation7], 128  }
  0x4f   :  { %280 = vsyncadd [#allocation7], 4294967168 }
  0x50   :  { %169 = vsyncpa [#allocation7], 1 }

</bundles_post_ra>
